<compile_context>
chip_gen: v6e
topology: v6e:2x2x1
jax: 0.10.0
libtpu: 0.0.40
codegen_flags: <defaults>
</compile_context>

<pallas_src>
import functools

import jax
import jax.numpy as jnp
from jax.experimental import pallas as pl
from jax.experimental.pallas import tpu as pltpu

LANE = 128      # feature (lane) padding
SUBLANE = 16    # row padding granule (bf16-friendly)


def _round_up(n, m):
    return ((n + m - 1) // m) * m


def _pad2d(w, pad):
    k, n = w.shape
    return jnp.pad(w, ((0, _round_up(k, pad) - k), (0, _round_up(n, pad) - n)))


def _pad_row(b, pad):
    n = b.shape[0]
    return jnp.pad(b, (0, _round_up(n, pad) - n)).reshape(1, -1)


# ----------------------------------------------------------------------------
# Fused kernel
# ----------------------------------------------------------------------------
def _mlp_fused_kernel(x_ref, *refs, num_hidden, out_valid, last_act):
    """refs = (W0, b0, W1, b1, ..., W_last, b_last, o_ref).

    h = ReLU(h_bf16 @ W_bf16 + b) per hidden layer (BatchNorm already folded
    into W/b), then out = act(h_bf16 @ W_last + b_last).  All accumulation and
    epilogue math in f32; only the MXU inputs are bf16.
    """
    o_ref = refs[-1]
    wb = refs[:-1]

    h = x_ref[...]                                     # f32 activations
    for l in range(num_hidden):
        w = wb[2 * l][...]                             # bf16 weights (BN folded)
        b = wb[2 * l + 1][...]                         # f32 bias   (BN folded)
        h = jnp.dot(h.astype(jnp.bfloat16), w,
                    preferred_element_type=jnp.float32) + b
        h = jnp.maximum(h, 0.0)
        # TODO(synk): nn.Dropout(p=drop_rate) is identity in eval mode; the
        # training-mode dropout randomness is not reproduced here.

    w = wb[2 * num_hidden][...]
    b = wb[2 * num_hidden + 1][...]
    acc = jnp.dot(h.astype(jnp.bfloat16), w,
                  preferred_element_type=jnp.float32) + b

    if last_act == "sigmoid":
        # Saturating exact sigmoid: exp never overflows, exact divide (once
        # per output tile, negligible cost).
        z = jnp.exp(-jnp.abs(acc))
        acc = jnp.where(acc >= 0.0, 1.0 / (1.0 + z), z / (1.0 + z))
    elif last_act == "softmax":
        # Mask lane-padded columns so they don't contribute to the softmax.
        lane = jax.lax.broadcasted_iota(jnp.int32, acc.shape, 1)
        acc = jnp.where(lane < out_valid, acc, -jnp.inf)
        m = jnp.max(acc, axis=-1, keepdims=True)
        e = jnp.exp(acc - m)
        acc = e / jnp.sum(e, axis=-1, keepdims=True)   # exact divide
    # last_act == "none": passthrough

    o_ref[...] = acc.astype(o_ref.dtype)


# ----------------------------------------------------------------------------
# Parameter handling
# ----------------------------------------------------------------------------
def init_mlp_params(key, input_dim, hidden_nbs, out_dim):
    """Deterministic init mimicking PyTorch defaults (uniform +-1/sqrt(fan_in))."""
    params = {"hidden": [], "out": None}
    in_d = input_dim
    for nb in hidden_nbs:
        key, k1, k2, k3, k4 = jax.random.split(key, 5)
        bound = 1.0 / (in_d ** 0.5)
        W = jax.random.uniform(k1, (nb, in_d), jnp.float32, -bound, bound)
        b = jax.random.uniform(k2, (nb,), jnp.float32, -bound, bound)
        gamma = jax.random.uniform(k3, (nb,), jnp.float32, 0.5, 1.5)
        beta = jax.random.uniform(k4, (nb,), jnp.float32, -0.1, 0.1)
        params["hidden"].append(dict(
            W=W, b=b, gamma=gamma, beta=beta,
            running_mean=jnp.zeros((nb,), jnp.float32),
            running_var=jnp.ones((nb,), jnp.float32),
        ))
        in_d = nb
    key, k1, k2 = jax.random.split(key, 3)
    bound = 1.0 / (in_d ** 0.5)
    W = jax.random.uniform(k1, (out_dim, in_d), jnp.float32, -bound, bound)
    b = jax.random.uniform(k2, (out_dim,), jnp.float32, -bound, bound)
    params["out"] = dict(W=W, b=b)
    return params


def prepare_params(params, bn_eps=1e-5, pad=LANE):
    """One-time prep: transpose, fold eval-mode BatchNorm into W/b, pad to 128,
    cast weights to bf16 (biases stay f32).  Padding is applied AFTER the BN
    fold so padded rows/cols/biases remain exactly zero.
    """
    prepared = []
    for layer in params["hidden"]:
        scale = layer["gamma"] / jnp.sqrt(layer["running_var"] + bn_eps)
        shift = layer["beta"] - layer["running_mean"] * scale
        W = layer["W"].T * scale[None, :]              # (in, out), BN scale folded
        b = layer["b"] * scale + shift                 # BN shift folded
        prepared.append((_pad2d(W, pad).astype(jnp.bfloat16),
                         _pad_row(b, pad).astype(jnp.float32)))
    W = params["out"]["W"].T
    b = params["out"]["b"]
    prepared.append((_pad2d(W, pad).astype(jnp.bfloat16),
                     _pad_row(b, pad).astype(jnp.float32)))
    return prepared


# ----------------------------------------------------------------------------
# Forward wrapper
# ----------------------------------------------------------------------------
def _weight_bytes(prepared):
    return sum(W.size * W.dtype.itemsize + b.size * b.dtype.itemsize
               for W, b in prepared)


def _choose_tm(M, prepared, vmem_budget=40 << 20):
    """Largest row tile (multiple of 16) fitting a conservative VMEM budget,
    capped by the padded batch; split into >=2 tiles when possible so the
    'parallel' batch axis can shard across v7x's 2 TensorCores."""
    Kp = prepared[0][0].shape[0]
    Np = prepared[-1][0].shape[1]
    widths = [W.shape[1] for W, _ in prepared]
    w_bytes = _weight_bytes(prepared)

    Mp16 = _round_up(M, SUBLANE)
    tm = SUBLANE
    for cand in (1024, 512, 256, 128, 64, 32, 16):
        act_bytes = 2 * cand * (Kp + Np) * 4 + cand * max(widths) * 4
        if w_bytes + act_bytes <= vmem_budget:
            tm = cand
            break
    tm = min(tm, Mp16)
    if Mp16 <= tm and Mp16 >= 2 * SUBLANE:
        tm = max(SUBLANE, ((Mp16 // 2) // SUBLANE) * SUBLANE)
    return tm


def mlp_forward(prepared, x, out_dim, last_act="sigmoid"):
    """Fused forward pass (inference semantics). x: (M, K) f32."""
    num_hidden = len(prepared) - 1
    M, K = x.shape
    Kp = prepared[0][0].shape[0]                       # padded input width
    Np = prepared[-1][0].shape[1]                      # padded output width
    act = last_act if last_act in ("sigmoid", "softmax") else "none"

    tm = _choose_tm(M, prepared)
    Mp = _round_up(M, tm)

    # Skip the host-side pad when already aligned (avoids an extra HBM pass).
    if (Mp, Kp) == (M, K):
        xp = x
    else:
        xp = jnp.pad(x, ((0, Mp - M), (0, Kp - K)))

    grid = (Mp // tm,)
    kernel = functools.partial(_mlp_fused_kernel, num_hidden=num_hidden,
                               out_valid=out_dim, last_act=act)
    widths = [W.shape[1] for W, _ in prepared]
    w_bytes = _weight_bytes(prepared)

    def run(single_buffer_weights):
        if single_buffer_weights:
            # Grid-invariant blocks: no point double-buffering them.
            def const_spec(shape):
                return pl.BlockSpec(shape, lambda i: (0, 0),
                                    pipeline_mode=pl.Buffered(1))
            w_mult = 1
        else:
            def const_spec(shape):
                return pl.BlockSpec(shape, lambda i: (0, 0))
            w_mult = 2

        in_specs = [pl.BlockSpec((tm, Kp), lambda i: (i, 0))]   # streamed x tile
        flat_args = [xp]
        for (W, b) in prepared:
            in_specs.append(const_spec(W.shape))                # resident W (bf16)
            in_specs.append(const_spec(b.shape))                # resident b (f32)
            flat_args.extend([W, b])

        vmem_bytes = (w_mult * w_bytes                 # resident weights/biases
                      + 2 * tm * (Kp + Np) * 4         # double-buffered x / out
                      + tm * max(widths) * 4           # widest live f32 h
                      + (4 << 20))                     # headroom
        vmem_bytes = int(min(max(vmem_bytes, 16 << 20), 64 << 20))

        return pl.pallas_call(
            kernel,
            out_shape=jax.ShapeDtypeStruct((Mp, Np), x.dtype),
            grid_spec=pltpu.PrefetchScalarGridSpec(
                num_scalar_prefetch=0,
                grid=grid,
                in_specs=in_specs,
                out_specs=pl.BlockSpec((tm, Np), lambda i: (i, 0)),
            ),
            compiler_params=pltpu.CompilerParams(
                dimension_semantics=("parallel",),
                vmem_limit_bytes=vmem_bytes),
        )(*flat_args)

    try:
        out = run(True)        # single-buffered resident weights
    except Exception:          # pipeline_mode/Buffered(1) unsupported -> default
        out = run(False)

    if (Mp, Np) == (M, out_dim):
        return out
    return out[:M, :out_dim]


# ----------------------------------------------------------------------------
# References
# ----------------------------------------------------------------------------
def mlp_reference(params, x, last_act="sigmoid", bn_eps=1e-5):
    """Pure-JAX f32 reference matching the PyTorch module in eval mode."""
    h = x
    for layer in params["hidden"]:
        h = h @ layer["W"].T + layer["b"]
        scale = layer["gamma"] / jnp.sqrt(layer["running_var"] + bn_eps)
        h = (h - layer["running_mean"]) * scale + layer["beta"]
        h = jnp.maximum(h, 0.0)
    h = h @ params["out"]["W"].T + params["out"]["b"]
    if last_act == "sigmoid":
        h = jax.nn.sigmoid(h)
    elif last_act == "softmax":
        h = jax.nn.softmax(h, axis=-1)
    return h


def mlp_kernel_numerics_reference(prepared, x, out_dim, last_act="sigmoid"):
    """Pure-JAX replica of the kernel's numerics (bf16 matmul inputs, f32 acc)."""
    M, K = x.shape
    Kp = prepared[0][0].shape[0]
    h = jnp.pad(x, ((0, 0), (0, Kp - K)))
    for (W, b) in prepared[:-1]:
        h = jnp.dot(h.astype(jnp.bfloat16), W,
                    preferred_element_type=jnp.float32) + b
        h = jnp.maximum(h, 0.0)
    W, b = prepared[-1]
    h = jnp.dot(h.astype(jnp.bfloat16), W,
                preferred_element_type=jnp.float32) + b
    h = h[:, :out_dim]
    if last_act == "sigmoid":
        h = jax.nn.sigmoid(h)
    elif last_act == "softmax":
        h = jax.nn.softmax(h, axis=-1)
    return h


# ----------------------------------------------------------------------------
if __name__ == "__main__":
    # Shapes consistent with the module: batch=8, input_dim=32,
    # hidden_nbs=[64, 32], out_dim=16.
    batch, input_dim, hidden_nbs, out_dim = 8, 32, [64, 32], 16

    key = jax.random.PRNGKey(0)
    key, kx, kp = jax.random.split(key, 3)
    x = jax.random.normal(kx, (batch, input_dim), jnp.float32)
    params = init_mlp_params(kp, input_dim, hidden_nbs, out_dim)

    prepared = prepare_params(params)   # one-time: W^T, BN fold, pad, bf16 cast

    out_sig = jax.block_until_ready(mlp_forward(prepared, x, out_dim, "sigmoid"))
    out_sm = jax.block_until_ready(mlp_forward(prepared, x, out_dim, "softmax"))

    ref_sig = mlp_reference(params, x, "sigmoid")
    ref_sm = mlp_reference(params, x, "softmax")
    kref_sig = mlp_kernel_numerics_reference(prepared, x, out_dim, "sigmoid")
    kref_sm = mlp_kernel_numerics_reference(prepared, x, out_dim, "softmax")

    assert out_sig.shape == (batch, out_dim)
    assert out_sm.shape == (batch, out_dim)
    # Exact sigmoid/softmax (no approx reciprocal): true probability ranges.
    assert bool(jnp.all((out_sig >= 0.0) & (out_sig <= 1.0)))
    assert float(jnp.max(jnp.abs(jnp.sum(out_sm, axis=-1) - 1.0))) < 1e-5
    # Tight check vs a pure-JAX replica of the kernel's bf16-matmul numerics.
    assert float(jnp.max(jnp.abs(out_sig - kref_sig))) < 2e-3
    assert float(jnp.max(jnp.abs(out_sm - kref_sm))) < 2e-3
    # Looser check vs the f32 PyTorch-semantics reference (bf16 matmul error).
    assert float(jnp.max(jnp.abs(out_sig - ref_sig))) < 2e-2
    assert float(jnp.max(jnp.abs(out_sm - ref_sm))) < 2e-2
    print("KERNEL_OK")
</pallas_src>

<mosaic_0001>
module attributes {stable_mosaic.version = 11 : i64} {
  func.func @_mlp_fused_kernel(%arg0: i32, %arg1: memref<16x128xf32, #tpu.memory_space<vmem>>, %arg2: memref<128x128xbf16, #tpu.memory_space<vmem>>, %arg3: memref<1x128xf32, #tpu.memory_space<vmem>>, %arg4: memref<128x128xbf16, #tpu.memory_space<vmem>>, %arg5: memref<1x128xf32, #tpu.memory_space<vmem>>, %arg6: memref<128x128xbf16, #tpu.memory_space<vmem>>, %arg7: memref<1x128xf32, #tpu.memory_space<vmem>>, %arg8: memref<16x128xf32, #tpu.memory_space<vmem>>) attributes {dimension_semantics = [#tpu.dimension_semantics<parallel>], iteration_bounds = array<i64: 1>, scalar_prefetch = 0 : i64, scratch_operands = 0 : i64, tpu.core_type = #tpu.core_type<tc>, window_params = [{transform_indices = @transform_0, window_bounds = array<i64: 16, 128>}, {pipeline_mode = #tpu.pipeline_mode<synchronous>, transform_indices = @transform_1, window_bounds = array<i64: 128, 128>}, {pipeline_mode = #tpu.pipeline_mode<synchronous>, transform_indices = @transform_2, window_bounds = array<i64: 1, 128>}, {pipeline_mode = #tpu.pipeline_mode<synchronous>, transform_indices = @transform_3, window_bounds = array<i64: 128, 128>}, {pipeline_mode = #tpu.pipeline_mode<synchronous>, transform_indices = @transform_4, window_bounds = array<i64: 1, 128>}, {pipeline_mode = #tpu.pipeline_mode<synchronous>, transform_indices = @transform_5, window_bounds = array<i64: 128, 128>}, {pipeline_mode = #tpu.pipeline_mode<synchronous>, transform_indices = @transform_6, window_bounds = array<i64: 1, 128>}, {transform_indices = @transform_7, window_bounds = array<i64: 16, 128>}]} {
    %c0 = arith.constant 0 : index
    %c0_0 = arith.constant 0 : index
    %0 = vector.load %arg1[%c0, %c0_0] : memref<16x128xf32, #tpu.memory_space<vmem>>, vector<16x128xf32>
    %c0_1 = arith.constant 0 : index
    %c0_2 = arith.constant 0 : index
    %1 = vector.load %arg2[%c0_1, %c0_2] : memref<128x128xbf16, #tpu.memory_space<vmem>>, vector<128x128xbf16>
    %c0_3 = arith.constant 0 : index
    %c0_4 = arith.constant 0 : index
    %2 = vector.load %arg3[%c0_3, %c0_4] : memref<1x128xf32, #tpu.memory_space<vmem>>, vector<1x128xf32>
    %3 = arith.truncf %0 : vector<16x128xf32> to vector<16x128xbf16>
    %cst = arith.constant dense<0.000000e+00> : vector<16x128xf32>
    %4 = tpu.matmul %3, %1, %cst {dimension_numbers = #tpu.dot_dimension_numbers<[1], [0], [0], [1], [0, 0, 1, 1], [], []>} : vector<16x128xbf16>, vector<128x128xbf16>, vector<16x128xf32> -> vector<16x128xf32>
    %5 = vector.broadcast %2 : vector<1x128xf32> to vector<16x128xf32>
    %6 = arith.addf %4, %5 : vector<16x128xf32>
    %cst_5 = arith.constant 0.000000e+00 : f32
    %7 = vector.broadcast %cst_5 : f32 to vector<16x128xf32>
    %8 = arith.maximumf %6, %7 : vector<16x128xf32>
    %c0_6 = arith.constant 0 : index
    %c0_7 = arith.constant 0 : index
    %9 = vector.load %arg4[%c0_6, %c0_7] : memref<128x128xbf16, #tpu.memory_space<vmem>>, vector<128x128xbf16>
    %c0_8 = arith.constant 0 : index
    %c0_9 = arith.constant 0 : index
    %10 = vector.load %arg5[%c0_8, %c0_9] : memref<1x128xf32, #tpu.memory_space<vmem>>, vector<1x128xf32>
    %11 = arith.truncf %8 : vector<16x128xf32> to vector<16x128xbf16>
    %cst_10 = arith.constant dense<0.000000e+00> : vector<16x128xf32>
    %12 = tpu.matmul %11, %9, %cst_10 {dimension_numbers = #tpu.dot_dimension_numbers<[1], [0], [0], [1], [0, 0, 1, 1], [], []>} : vector<16x128xbf16>, vector<128x128xbf16>, vector<16x128xf32> -> vector<16x128xf32>
    %13 = vector.broadcast %10 : vector<1x128xf32> to vector<16x128xf32>
    %14 = arith.addf %12, %13 : vector<16x128xf32>
    %cst_11 = arith.constant 0.000000e+00 : f32
    %15 = vector.broadcast %cst_11 : f32 to vector<16x128xf32>
    %16 = arith.maximumf %14, %15 : vector<16x128xf32>
    %c0_12 = arith.constant 0 : index
    %c0_13 = arith.constant 0 : index
    %17 = vector.load %arg6[%c0_12, %c0_13] : memref<128x128xbf16, #tpu.memory_space<vmem>>, vector<128x128xbf16>
    %c0_14 = arith.constant 0 : index
    %c0_15 = arith.constant 0 : index
    %18 = vector.load %arg7[%c0_14, %c0_15] : memref<1x128xf32, #tpu.memory_space<vmem>>, vector<1x128xf32>
    %19 = arith.truncf %16 : vector<16x128xf32> to vector<16x128xbf16>
    %cst_16 = arith.constant dense<0.000000e+00> : vector<16x128xf32>
    %20 = tpu.matmul %19, %17, %cst_16 {dimension_numbers = #tpu.dot_dimension_numbers<[1], [0], [0], [1], [0, 0, 1, 1], [], []>} : vector<16x128xbf16>, vector<128x128xbf16>, vector<16x128xf32> -> vector<16x128xf32>
    %21 = vector.broadcast %18 : vector<1x128xf32> to vector<16x128xf32>
    %22 = arith.addf %20, %21 : vector<16x128xf32>
    %23 = math.absf %22 : vector<16x128xf32>
    %cst_17 = arith.constant 0.000000e+00 : f32
    %24 = vector.broadcast %cst_17 : f32 to vector<16x128xf32>
    %25 = arith.subf %24, %23 : vector<16x128xf32>
    %26 = math.exp %25 : vector<16x128xf32>
    %cst_18 = arith.constant 0.000000e+00 : f32
    %27 = vector.broadcast %cst_18 : f32 to vector<16x128xf32>
    %28 = arith.cmpf oge, %22, %27 : vector<16x128xf32>
    %cst_19 = arith.constant 1.000000e+00 : f32
    %29 = vector.broadcast %cst_19 : f32 to vector<16x128xf32>
    %30 = arith.addf %29, %26 : vector<16x128xf32>
    %cst_20 = arith.constant 1.000000e+00 : f32
    %31 = vector.broadcast %cst_20 : f32 to vector<16x128xf32>
    %32 = arith.divf %31, %30 : vector<16x128xf32>
    %cst_21 = arith.constant 1.000000e+00 : f32
    %33 = vector.broadcast %cst_21 : f32 to vector<16x128xf32>
    %34 = arith.addf %33, %26 : vector<16x128xf32>
    %35 = arith.divf %26, %34 : vector<16x128xf32>
    %36 = arith.select %28, %32, %35 : vector<16x128xi1>, vector<16x128xf32>
    %c0_22 = arith.constant 0 : index
    %c0_23 = arith.constant 0 : index
    %37 = vector.load %arg8[%c0_22, %c0_23] : memref<16x128xf32, #tpu.memory_space<vmem>>, vector<16x128xf32>
    tpu.vector_store %arg8[%c0_22, %c0_23], %36 {strides = array<i32>} : memref<16x128xf32, #tpu.memory_space<vmem>>, vector<16x128xf32>,
    return
  }
  func.func @transform_0(%arg0: i32) -> (i32, i32) {
    %c0_i32 = arith.constant 0 : i32
    %c0_i32_0 = arith.constant 0 : i32
    return %arg0, %c0_i32 : i32, i32
  }
  func.func @transform_1(%arg0: i32) -> (i32, i32) {
    %c0_i32 = arith.constant 0 : i32
    %c0_i32_0 = arith.constant 0 : i32
    %c0_i32_1 = arith.constant 0 : i32
    return %c0_i32, %c0_i32_0 : i32, i32
  }
  func.func @transform_2(%arg0: i32) -> (i32, i32) {
    %c0_i32 = arith.constant 0 : i32
    %c0_i32_0 = arith.constant 0 : i32
    %c0_i32_1 = arith.constant 0 : i32
    return %c0_i32, %c0_i32_0 : i32, i32
  }
  func.func @transform_3(%arg0: i32) -> (i32, i32) {
    %c0_i32 = arith.constant 0 : i32
    %c0_i32_0 = arith.constant 0 : i32
    %c0_i32_1 = arith.constant 0 : i32
    return %c0_i32, %c0_i32_0 : i32, i32
  }
  func.func @transform_4(%arg0: i32) -> (i32, i32) {
    %c0_i32 = arith.constant 0 : i32
    %c0_i32_0 = arith.constant 0 : i32
    %c0_i32_1 = arith.constant 0 : i32
    return %c0_i32, %c0_i32_0 : i32, i32
  }
  func.func @transform_5(%arg0: i32) -> (i32, i32) {
    %c0_i32 = arith.constant 0 : i32
    %c0_i32_0 = arith.constant 0 : i32
    %c0_i32_1 = arith.constant 0 : i32
    return %c0_i32, %c0_i32_0 : i32, i32
  }
  func.func @transform_6(%arg0: i32) -> (i32, i32) {
    %c0_i32 = arith.constant 0 : i32
    %c0_i32_0 = arith.constant 0 : i32
    %c0_i32_1 = arith.constant 0 : i32
    return %c0_i32, %c0_i32_0 : i32, i32
  }
  func.func @transform_7(%arg0: i32) -> (i32, i32) {
    %c0_i32 = arith.constant 0 : i32
    %c0_i32_0 = arith.constant 0 : i32
    return %arg0, %c0_i32 : i32, i32
  }
}

module attributes {stable_mosaic.version = 11 : i64} {
  func.func @_mlp_fused_kernel(%arg0: i32, %arg1: memref<16x128xf32, #tpu.memory_space<vmem>>, %arg2: memref<128x128xbf16, #tpu.memory_space<vmem>>, %arg3: memref<1x128xf32, #tpu.memory_space<vmem>>, %arg4: memref<128x128xbf16, #tpu.memory_space<vmem>>, %arg5: memref<1x128xf32, #tpu.memory_space<vmem>>, %arg6: memref<128x128xbf16, #tpu.memory_space<vmem>>, %arg7: memref<1x128xf32, #tpu.memory_space<vmem>>, %arg8: memref<16x128xf32, #tpu.memory_space<vmem>>) attributes {dimension_semantics = [#tpu.dimension_semantics<parallel>], iteration_bounds = array<i64: 1>, scalar_prefetch = 0 : i64, scratch_operands = 0 : i64, tpu.core_type = #tpu.core_type<tc>, window_params = [{transform_indices = @transform_0, window_bounds = array<i64: 16, 128>}, {pipeline_mode = #tpu.pipeline_mode<synchronous>, transform_indices = @transform_1, window_bounds = array<i64: 128, 128>}, {pipeline_mode = #tpu.pipeline_mode<synchronous>, transform_indices = @transform_2, window_bounds = array<i64: 1, 128>}, {pipeline_mode = #tpu.pipeline_mode<synchronous>, transform_indices = @transform_3, window_bounds = array<i64: 128, 128>}, {pipeline_mode = #tpu.pipeline_mode<synchronous>, transform_indices = @transform_4, window_bounds = array<i64: 1, 128>}, {pipeline_mode = #tpu.pipeline_mode<synchronous>, transform_indices = @transform_5, window_bounds = array<i64: 128, 128>}, {pipeline_mode = #tpu.pipeline_mode<synchronous>, transform_indices = @transform_6, window_bounds = array<i64: 1, 128>}, {transform_indices = @transform_7, window_bounds = array<i64: 16, 128>}]} {
    %c0 = arith.constant 0 : index
    %c0_0 = arith.constant 0 : index
    %0 = vector.load %arg1[%c0, %c0_0] : memref<16x128xf32, #tpu.memory_space<vmem>>, vector<16x128xf32>
    %c0_1 = arith.constant 0 : index
    %c0_2 = arith.constant 0 : index
    %1 = vector.load %arg2[%c0_1, %c0_2] : memref<128x128xbf16, #tpu.memory_space<vmem>>, vector<128x128xbf16>
    %c0_3 = arith.constant 0 : index
    %c0_4 = arith.constant 0 : index
    %2 = vector.load %arg3[%c0_3, %c0_4] : memref<1x128xf32, #tpu.memory_space<vmem>>, vector<1x128xf32>
    %3 = arith.truncf %0 : vector<16x128xf32> to vector<16x128xbf16>
    %cst = arith.constant dense<0.000000e+00> : vector<16x128xf32>
    %4 = tpu.matmul %3, %1, %cst {dimension_numbers = #tpu.dot_dimension_numbers<[1], [0], [0], [1], [0, 0, 1, 1], [], []>} : vector<16x128xbf16>, vector<128x128xbf16>, vector<16x128xf32> -> vector<16x128xf32>
    %5 = vector.broadcast %2 : vector<1x128xf32> to vector<16x128xf32>
    %6 = arith.addf %4, %5 : vector<16x128xf32>
    %cst_5 = arith.constant 0.000000e+00 : f32
    %7 = vector.broadcast %cst_5 : f32 to vector<16x128xf32>
    %8 = arith.maximumf %6, %7 : vector<16x128xf32>
    %c0_6 = arith.constant 0 : index
    %c0_7 = arith.constant 0 : index
    %9 = vector.load %arg4[%c0_6, %c0_7] : memref<128x128xbf16, #tpu.memory_space<vmem>>, vector<128x128xbf16>
    %c0_8 = arith.constant 0 : index
    %c0_9 = arith.constant 0 : index
    %10 = vector.load %arg5[%c0_8, %c0_9] : memref<1x128xf32, #tpu.memory_space<vmem>>, vector<1x128xf32>
    %11 = arith.truncf %8 : vector<16x128xf32> to vector<16x128xbf16>
    %cst_10 = arith.constant dense<0.000000e+00> : vector<16x128xf32>
    %12 = tpu.matmul %11, %9, %cst_10 {dimension_numbers = #tpu.dot_dimension_numbers<[1], [0], [0], [1], [0, 0, 1, 1], [], []>} : vector<16x128xbf16>, vector<128x128xbf16>, vector<16x128xf32> -> vector<16x128xf32>
    %13 = vector.broadcast %10 : vector<1x128xf32> to vector<16x128xf32>
    %14 = arith.addf %12, %13 : vector<16x128xf32>
    %cst_11 = arith.constant 0.000000e+00 : f32
    %15 = vector.broadcast %cst_11 : f32 to vector<16x128xf32>
    %16 = arith.maximumf %14, %15 : vector<16x128xf32>
    %c0_12 = arith.constant 0 : index
    %c0_13 = arith.constant 0 : index
    %17 = vector.load %arg6[%c0_12, %c0_13] : memref<128x128xbf16, #tpu.memory_space<vmem>>, vector<128x128xbf16>
    %c0_14 = arith.constant 0 : index
    %c0_15 = arith.constant 0 : index
    %18 = vector.load %arg7[%c0_14, %c0_15] : memref<1x128xf32, #tpu.memory_space<vmem>>, vector<1x128xf32>
    %19 = arith.truncf %16 : vector<16x128xf32> to vector<16x128xbf16>
    %cst_16 = arith.constant dense<0.000000e+00> : vector<16x128xf32>
    %20 = tpu.matmul %19, %17, %cst_16 {dimension_numbers = #tpu.dot_dimension_numbers<[1], [0], [0], [1], [0, 0, 1, 1], [], []>} : vector<16x128xbf16>, vector<128x128xbf16>, vector<16x128xf32> -> vector<16x128xf32>
    %21 = vector.broadcast %18 : vector<1x128xf32> to vector<16x128xf32>
    %22 = arith.addf %20, %21 : vector<16x128xf32>
    %23 = math.absf %22 : vector<16x128xf32>
    %cst_17 = arith.constant 0.000000e+00 : f32
    %24 = vector.broadcast %cst_17 : f32 to vector<16x128xf32>
    %25 = arith.subf %24, %23 : vector<16x128xf32>
    %26 = math.exp %25 : vector<16x128xf32>
    %cst_18 = arith.constant 0.000000e+00 : f32
    %27 = vector.broadcast %cst_18 : f32 to vector<16x128xf32>
    %28 = arith.cmpf oge, %22, %27 : vector<16x128xf32>
    %cst_19 = arith.constant 1.000000e+00 : f32
    %29 = vector.broadcast %cst_19 : f32 to vector<16x128xf32>
    %30 = arith.addf %29, %26 : vector<16x128xf32>
    %cst_20 = arith.constant 1.000000e+00 : f32
    %31 = vector.broadcast %cst_20 : f32 to vector<16x128xf32>
    %32 = arith.divf %31, %30 : vector<16x128xf32>
    %cst_21 = arith.constant 1.000000e+00 : f32
    %33 = vector.broadcast %cst_21 : f32 to vector<16x128xf32>
    %34 = arith.addf %33, %26 : vector<16x128xf32>
    %35 = arith.divf %26, %34 : vector<16x128xf32>
    %36 = arith.select %28, %32, %35 : vector<16x128xi1>, vector<16x128xf32>
    %c0_22 = arith.constant 0 : index
    %c0_23 = arith.constant 0 : index
    %37 = vector.load %arg8[%c0_22, %c0_23] : memref<16x128xf32, #tpu.memory_space<vmem>>, vector<16x128xf32>
    tpu.vector_store %arg8[%c0_22, %c0_23], %36 {strides = array<i32>} : memref<16x128xf32, #tpu.memory_space<vmem>>, vector<16x128xf32>,
    return
  }
  func.func @transform_0(%arg0: i32) -> (i32, i32) {
    %c0_i32 = arith.constant 0 : i32
    %c0_i32_0 = arith.constant 0 : i32
    return %arg0, %c0_i32 : i32, i32
  }
  func.func @transform_1(%arg0: i32) -> (i32, i32) {
    %c0_i32 = arith.constant 0 : i32
    %c0_i32_0 = arith.constant 0 : i32
    %c0_i32_1 = arith.constant 0 : i32
    return %c0_i32, %c0_i32_0 : i32, i32
  }
  func.func @transform_2(%arg0: i32) -> (i32, i32) {
    %c0_i32 = arith.constant 0 : i32
    %c0_i32_0 = arith.constant 0 : i32
    %c0_i32_1 = arith.constant 0 : i32
    return %c0_i32, %c0_i32_0 : i32, i32
  }
  func.func @transform_3(%arg0: i32) -> (i32, i32) {
    %c0_i32 = arith.constant 0 : i32
    %c0_i32_0 = arith.constant 0 : i32
    %c0_i32_1 = arith.constant 0 : i32
    return %c0_i32, %c0_i32_0 : i32, i32
  }
  func.func @transform_4(%arg0: i32) -> (i32, i32) {
    %c0_i32 = arith.constant 0 : i32
    %c0_i32_0 = arith.constant 0 : i32
    %c0_i32_1 = arith.constant 0 : i32
    return %c0_i32, %c0_i32_0 : i32, i32
  }
  func.func @transform_5(%arg0: i32) -> (i32, i32) {
    %c0_i32 = arith.constant 0 : i32
    %c0_i32_0 = arith.constant 0 : i32
    %c0_i32_1 = arith.constant 0 : i32
    return %c0_i32, %c0_i32_0 : i32, i32
  }
  func.func @transform_6(%arg0: i32) -> (i32, i32) {
    %c0_i32 = arith.constant 0 : i32
    %c0_i32_0 = arith.constant 0 : i32
    %c0_i32_1 = arith.constant 0 : i32
    return %c0_i32, %c0_i32_0 : i32, i32
  }
  func.func @transform_7(%arg0: i32) -> (i32, i32) {
    %c0_i32 = arith.constant 0 : i32
    %c0_i32_0 = arith.constant 0 : i32
    return %arg0, %c0_i32 : i32, i32
  }
}

</mosaic_0001>

<bundles_post_ra>
// kernel: tpu_custom_call.1
= control target key start
LH: loop header
LB: loop body
LE: loop exit
PB: predicated region body
PF: predicated region fallthrough
CT: control target
= control target key end

     0   :  { %12 = vsyncpa [#allocation3], 0  ;;  %s854_s0 = inlined_call_operand.hbm [shape: f32[16,128], index: 0, kind: input, shape index: {}]   ;;  %s855_s1 = inlined_call_operand.hbm [shape: bf16[128,128], index: 1, kind: input, shape index: {}]   ;;  %s856_s2 = inlined_call_operand.vmem [shape: f32[1,128], index: 2, kind: input, shape index: {}]   ;;  %s857_s3 = inlined_call_operand.hbm [shape: bf16[128,128], index: 3, kind: input, shape index: {}]   ;;  %s858_s4 = inlined_call_operand.vmem [shape: f32[1,128], index: 4, kind: input, shape index: {}]   ;;  %s859_s5 = inlined_call_operand.hbm [shape: bf16[128,128], index: 5, kind: input, shape index: {}]   ;;  %s860_s6 = inlined_call_operand.vmem [shape: f32[1,128], index: 6, kind: input, shape index: {}]   ;;  %s861_s7 = inlined_call_operand.hbm [shape: f32[16,128], index: 7, kind: output, shape index: {}]  }
   0x1   :  { %13 = vsyncpa [#allocation6], 0 }
   0x2   :  { %14 = vsyncpa [#allocation9], 0 }
   0x3   :  { %15 = vsyncpa [#allocation4], 0  ;;  %s734_s24 = smov [#allocation5]  }
   0x4   :  { %s33_s25 = sshll.u32 %s734_s24, 4  ;;  %s34_s25 = int_to_ptr.vmem [resolvable:$true] %s33_s25 }
   0x5   :  { %s634_s26 = scalar_lea.vmem %s34_s25, 1024  ;;  %p639_p1 = scmp.lt.s32.totalorder %s34_s25, %s34_s25 }
   0x6   :  { %p635_p0 = scmp.ne.s32.totalorder %s34_s25, %s634_s26  ;;  %p640_p2 = scmp.lt.s32.totalorder %s634_s26, %s634_s26 }
   0x8   :  { %p641_p3 = por %p640_p2, %p639_p1 }
   0xa   :  { %p642_p4 = pnand %p641_p3, %p635_p0 }
   0xc   :  { %645 = shalt.err (!%p642_p4)
}
   0xd   :  { %s735_s27 = smov 64   ;;  %s736_s28 = smov 4  }
   0xe   :  { %39 = dma.hbm_to_vmem [thread:$0]  %s855_s1, 1024, %s34_s25, [#allocation6], %s735_s27, %s735_s27, %s736_s28  }
   0xf   :  { %s737_s8 = smov [#allocation2]  }
  0x10   :  { %s21_s9 = sshll.u32 %s737_s8, 4  ;;  %s22_s9 = int_to_ptr.vmem [resolvable:$true] %s21_s9 }
  0x11   :  { %s654_s10 = scalar_lea.vmem %s22_s9, 256  ;;  %p659_p6 = scmp.lt.s32.totalorder %s22_s9, %s22_s9 }
  0x12   :  { %p655_p5 = scmp.ne.s32.totalorder %s22_s9, %s654_s10  ;;  %p660_p7 = scmp.lt.s32.totalorder %s654_s10, %s654_s10 }
  0x14   :  { %p661_p8 = por %p660_p7, %p659_p6 }
  0x16   :  { %p662_p9 = pnand %p661_p8, %p655_p5 }
  0x18   :  { %665 = shalt.err (!%p662_p9)
}
  0x19   :  { %s738_s11 = smov 128   ;;  %s739_s12 = smov 8  }
  0x1a   :  { %27 = dma.hbm_to_vmem [thread:$0]  %s854_s0, 256, %s22_s9, [#allocation3], %s738_s11, %s738_s11, %s739_s12  }
  0x1b   :  { %s740_s1 = smov [#allocation7]   ;;  %s741_s16 = smov [#allocation8]  }
  0x1c   :  { %s47_s15 = sshll.u32 %s740_s1, 4  ;;  %s61_s17 = sshll.u32 %s741_s16, 4  ;;  %s48_s15 = int_to_ptr.vmem [resolvable:$true] %s47_s15  ;;  %s62_s17 = int_to_ptr.vmem [resolvable:$true] %s61_s17 }
  0x1d   :  { %s674_s18 = scalar_lea.vmem %s48_s15, 1024  ;;  %p679_p11 = scmp.lt.s32.totalorder %s48_s15, %s48_s15 }
  0x1e   :  { %p675_p10 = scmp.ne.s32.totalorder %s48_s15, %s674_s18  ;;  %p680_p12 = scmp.lt.s32.totalorder %s674_s18, %s674_s18 }
  0x20   :  { %p681_p13 = por %p680_p12, %p679_p11 }
  0x22   :  { %p682_p0 = pnand %p681_p13, %p675_p10 }
  0x24   :  { %685 = shalt.err (!%p682_p0)
}
  0x25   :  { %53 = dma.hbm_to_vmem [thread:$0]  %s857_s3, 1024, %s48_s15, [#allocation6], %s735_s27, %s735_s27, %s736_s28  }
  0x26   :  { %s694_s0 = scalar_lea.vmem %s62_s17, 1024  ;;  %p699_p2 = scmp.lt.s32.totalorder %s62_s17, %s62_s17 }
  0x27   :  { %p695_p1 = scmp.ne.s32.totalorder %s62_s17, %s694_s0  ;;  %p700_p3 = scmp.lt.s32.totalorder %s694_s0, %s694_s0 }
  0x29   :  { %p701_p4 = por %p700_p3, %p699_p2 }
  0x2b   :  { %p702_p5 = pnand %p701_p4, %p695_p1 }
  0x2d   :  { %705 = shalt.err (!%p702_p5)
}
  0x2e   :  { %67 = dma.hbm_to_vmem [thread:$0]  %s859_s5, 1024, %s62_s17, [#allocation9], %s735_s27, %s735_s27, %s736_s28  }
  0x2f   :  { %726 = dma.done.wait [#allocation3], 256  }
  0x30   :  { %727 = vsyncadd [#allocation3], 4294967040 }
  0x31   :  { %728 = dma.done.wait [#allocation6], 2048  }
  0x32   :  { %729 = vsyncadd [#allocation6], 4294965248 }
  0x33   :  { %730 = dma.done.wait [#allocation9], 1024  }
  0x34   :  { %731 = vsyncadd [#allocation9], 4294966272  ;;  %v742_v0 = vmov 0.0   ;;  %vm743_vm0 = vmmov 0   ;;  %v594_v1 = vld [vmem:[#allocation5 + $0x38] sm:$0xff]   ;;  %v595_v2 = vld [vmem:[#allocation5 + $0x30] sm:$0xff]  }
  0x35   :  { %523 = vmatprep.subr.bf16.mxu0 %v742_v0  ;;  %539 = vmatprep.mubr.msk.bf16.mxu0 %vm743_vm0, %v742_v0  ;;  %v596_v3 = vld [vmem:[#allocation5 + $0x28] sm:$0xff]   ;;  %v602_v4 = vld [vmem:[#allocation7 + $0x38] sm:$0xff]   ;;  %v597_v5 = vld [vmem:[#allocation5 + $0x20] sm:$0xff]  }
  0x36   :  { %543 = vmatprep.subr.bf16.mxu1 %v742_v0  ;;  %559 = vmatprep.mubr.msk.bf16.mxu1 %vm743_vm0, %v742_v0  ;;  %v603_v6 = vld [vmem:[#allocation7 + $0x30] sm:$0xff]   ;;  %v598_v7 = vld [vmem:[#allocation5 + $0x18] sm:$0xff]   ;;  %v604_v8 = vld [vmem:[#allocation7 + $0x28] sm:$0xff]  }
  0x37   :  { %524 = vmatpush3.bf16.msra.mxu0 %v594_v1  ;;  %544 = vmatpush3.bf16.msra.mxu1 %v602_v4  ;;  %v599_v9 = vld [vmem:[#allocation5 + $0x10] sm:$0xff]   ;;  %v605_v10 = vld [vmem:[#allocation7 + $0x20] sm:$0xff]   ;;  %v600_v11 = vld [vmem:[#allocation5 + $0x8] sm:$0xff]  }
  0x38   :  { %525 = vmatprep.subr.bf16.mxu0 %v742_v0  ;;  %545 = vmatprep.subr.bf16.mxu1 %v742_v0  ;;  %v606_v12 = vld [vmem:[#allocation7 + $0x18] sm:$0xff]   ;;  %v601_v13 = vld [vmem:[#allocation5] sm:$0xff]   ;;  %v83_v14 = vld [vmem:[#allocation2] sm:$0xff] }
  0x39   :  { %v84_v15 = vld [vmem:[#allocation2 + $0x8] sm:$0xff]  ;;  %v607_v17 = vld [vmem:[#allocation7 + $0x10] sm:$0xff]   ;;  %v608_v18 = vld [vmem:[#allocation7 + $0x8] sm:$0xff]  }
  0x3a   :  { %v102_v16 = vpack.c.bf16 %v84_v15, %v83_v14  ;;  %v609_v19 = vld [vmem:[#allocation7] sm:$0xff]   ;;  %v610_v20 = vld [vmem:[#allocation8 + $0x38] sm:$0xff]   ;;  %v611_v21 = vld [vmem:[#allocation8 + $0x30] sm:$0xff]  }
  0x3b   :  { %526 = vmatpush3.bf16.msra.mxu0 %v595_v2  ;;  %546 = vmatpush3.bf16.msra.mxu1 %v603_v6  ;;  %v612_v22 = vld [vmem:[#allocation8 + $0x28] sm:$0xff]   ;;  %v613_v23 = vld [vmem:[#allocation8 + $0x20] sm:$0xff]   ;;  %v614_v24 = vld [vmem:[#allocation8 + $0x18] sm:$0xff]  }
  0x3c   :  { %527 = vmatprep.subr.bf16.mxu0 %v742_v0  ;;  %547 = vmatprep.subr.bf16.mxu1 %v742_v0  ;;  %v469_v25 = vld [vmem:[%s856_s2] ss:$0 sm:$0xff]  ;;  %v616_v36 = vld [vmem:[#allocation8 + $0x8] sm:$0xff]   ;;  %v617_v37 = vld [vmem:[#allocation8] sm:$0xff]  }
  0x3d   :  { %v615_v35 = vld [vmem:[#allocation8 + $0x10] sm:$0xff]  }
  0x3e   :  { %v478_v38 = vld [vmem:[%s858_s4] ss:$0 sm:$0xff]  ;;  %s744_s4 = smov [#allocation10]  }
  0x3f   :  { %528 = vmatpush3.bf16.msra.mxu0 %v596_v3  ;;  %548 = vmatpush3.bf16.msra.mxu1 %v604_v8  ;;  %v487_v48 = vld [vmem:[%s860_s6] ss:$0 sm:$0xff]  ;;  %s455_s6 = sshll.u32 %s744_s4, 4  ;;  %s456_s6 = int_to_ptr.vmem [resolvable:$true] %s455_s6 }
  0x40   :  { %529 = vmatprep.subr.bf16.mxu0 %v742_v0  ;;  %549 = vmatprep.subr.bf16.mxu1 %v742_v0  ;;  %s706_s26 = scalar_lea.vmem %s456_s6, 256  ;;  %p711_p7 = scmp.lt.s32.totalorder %s456_s6, %s456_s6 }
  0x41   :  { %p707_p6 = scmp.ne.s32.totalorder %s456_s6, %s706_s26  ;;  %p712_p8 = scmp.lt.s32.totalorder %s706_s26, %s706_s26 }
  0x43   :  { %530 = vmatpush3.bf16.msra.mxu0 %v597_v5  ;;  %550 = vmatpush3.bf16.msra.mxu1 %v605_v10  ;;  %p713_p9 = por %p712_p8, %p711_p7 }
  0x44   :  { %531 = vmatprep.subr.bf16.mxu0 %v742_v0  ;;  %551 = vmatprep.subr.bf16.mxu1 %v742_v0 }
  0x45   :  { %p714_p10 = pnand %p713_p9, %p707_p6 }
  0x47   :  { %532 = vmatpush3.bf16.msra.mxu0 %v598_v7  ;;  %552 = vmatpush3.bf16.msra.mxu1 %v606_v12 }
  0x48   :  { %533 = vmatprep.subr.bf16.mxu0 %v742_v0  ;;  %553 = vmatprep.subr.bf16.mxu1 %v742_v0 }
  0x4b   :  { %534 = vmatpush3.bf16.msra.mxu0 %v599_v9  ;;  %554 = vmatpush3.bf16.msra.mxu1 %v607_v17 }
  0x4c   :  { %535 = vmatprep.subr.bf16.mxu0 %v742_v0  ;;  %555 = vmatprep.subr.bf16.mxu1 %v742_v0 }
  0x4f   :  { %536 = vmatpush3.bf16.msra.mxu0 %v600_v11  ;;  %556 = vmatpush3.bf16.msra.mxu1 %v608_v18 }
  0x50   :  { %537 = vmatprep.subr.bf16.mxu0 %v742_v0  ;;  %557 = vmatprep.subr.bf16.mxu1 %v742_v0 }
  0x53   :  { %538 = vmatpush3.bf16.msra.mxu0 %v601_v13  ;;  %558 = vmatpush3.bf16.msra.mxu1 %v609_v19 }
  0x54   :  { %563 = vmatprep.subr.bf16.mxu0 %v742_v0 }
  0x56   :  { %540 = vmatmul.mubr.bf16.vlgmr.msra.gmra.mxu0 %v102_v16 }
  0x57   :  { %579 = vmatprep.mubr.msk.bf16.mxu0 %vm743_vm0, %v742_v0  ;;  %564 = vmatpush3.bf16.msra.mxu0 %v610_v20 }
  0x58   :  { %565 = vmatprep.subr.bf16.mxu0 %v742_v0 }
  0x5b   :  { %566 = vmatpush3.bf16.msra.mxu0 %v611_v21 }
  0x5c   :  { %567 = vmatprep.subr.bf16.mxu0 %v742_v0 }
  0x5f   :  { %568 = vmatpush3.bf16.msra.mxu0 %v612_v22 }
  0x60   :  { %569 = vmatprep.subr.bf16.mxu0 %v742_v0 }
  0x63   :  { %570 = vmatpush3.bf16.msra.mxu0 %v613_v23 }
  0x64   :  { %571 = vmatprep.subr.bf16.mxu0 %v742_v0 }
  0x67   :  { %572 = vmatpush3.bf16.msra.mxu0 %v614_v24 }
  0x68   :  { %573 = vmatprep.subr.bf16.mxu0 %v742_v0 }
  0x6b   :  { %574 = vmatpush3.bf16.msra.mxu0 %v615_v35 }
  0x6c   :  { %575 = vmatprep.subr.bf16.mxu0 %v742_v0 }
  0x6f   :  { %576 = vmatpush3.bf16.msra.mxu0 %v616_v36 }
  0x70   :  { %577 = vmatprep.subr.bf16.mxu0 %v742_v0 }
  0x73   :  { %578 = vmatpush3.bf16.msra.mxu0 %v617_v37 }
 0x116   :  { %v191_v26 = vpop.f32.mrf.mxu0 }
 0x117   :  { %v192_v28 = vadd.f32 %v469_v25, %v191_v26 }
 0x118   :  { %v541_v27 = vpop.f32.mrf.mxu0 }
 0x119   :  { %v198_v32 = vmax.f32 %v192_v28, 0.0 }
 0x11a   :  { %v194_v29 = vpop.f32.mrf.mxu0 }
 0x11b   :  { %v195_v30 = vadd.f32 %v469_v25, %v194_v29 }
 0x11c   :  { %v542_v31 = vpop.f32.mrf.mxu0 }
 0x11d   :  { %v199_v33 = vmax.f32 %v195_v30, 0.0 }
 0x11f   :  { %v217_v34 = vpack.c.bf16 %v199_v33, %v198_v32 }
 0x121   :  { %560 = vmatmul.mubr.bf16.vlgmr.msra.gmra.mxu1 %v217_v34 }
 0x1e1   :  { %v306_v39 = vpop.f32.mrf.mxu1 }
 0x1e2   :  { %v307_v41 = vadd.f32 %v478_v38, %v306_v39 }
 0x1e3   :  { %v561_v40 = vpop.f32.mrf.mxu1 }
 0x1e4   :  { %v313_v45 = vmax.f32 %v307_v41, 0.0 }
 0x1e5   :  { %v309_v42 = vpop.f32.mrf.mxu1 }
 0x1e6   :  { %v310_v43 = vadd.f32 %v478_v38, %v309_v42 }
 0x1e7   :  { %v562_v44 = vpop.f32.mrf.mxu1 }
 0x1e8   :  { %v314_v46 = vmax.f32 %v310_v43, 0.0 }
 0x1ea   :  { %v332_v47 = vpack.c.bf16 %v314_v46, %v313_v45 }
 0x1ec   :  { %580 = vmatmul.mubr.bf16.vlgmr.msra.gmra.mxu0 %v332_v47 }
 0x2ac   :  { %v421_v49 = vpop.f32.mrf.mxu0 }
 0x2ad   :  { %v422_v50 = vadd.f32 %v487_v48, %v421_v49 }
 0x2ae   :  { %v581_v51 = vpop.f32.mrf.mxu0 }
 0x2af   :  { %v428_v52 = vand.u32 2147483647, %v422_v50  ;;  %vm436_vm1 = vcmp.ge.f32.partialorder %v422_v50, 0.0 }
 0x2b0   :  { %v424_v53 = vpop.f32.mrf.mxu0 }
 0x2b1   :  { %v430_v54 = vsub.f32 0.0, %v428_v52  ;;  %v425_v55 = vadd.f32 %v487_v48, %v424_v53 }
 0x2b2   :  { %v582_v56 = vpop.f32.mrf.mxu0 }
 0x2b3   :  { %v432_v57 = vmul.f32 1.442695, %v430_v54  ;;  %v429_v58 = vand.u32 2147483647, %v425_v55  ;;  %vm437_vm2 = vcmp.ge.f32.partialorder %v425_v55, 0.0 }
 0x2b5   :  { %618 = vpow2.f32 %v432_v57  ;;  %v431_v59 = vsub.f32 0.0, %v429_v58 }
 0x2b7   :  { %v434_v60 = vmul.f32 1.442695, %v431_v59 }
 0x2b9   :  { %620 = vpow2.f32 %v434_v60 }
 0x2c2   :  { %v619_v61 = vpop.eup %618 }
 0x2c3   :  { %v438_v62 = vadd.f32 1.0, %v619_v61 }
 0x2c5   :  { %622 = vrcp.f32 %v438_v62 }
 0x2c6   :  { %v621_v63 = vpop.eup %620 }
 0x2c7   :  { %v439_v0 = vadd.f32 1.0, %v621_v63 }
 0x2c9   :  { %624 = vrcp.f32 %v439_v0 }
 0x2d2   :  { %v623_v1 = vpop.eup %622 }
 0x2d3   :  { %v444_v2 = vmul.f32 %v623_v1, %v619_v61 }
 0x2d5   :  { %v446_v3 = vsel %vm436_vm1, %v623_v1, %v444_v2 }
 0x2d6   :  { %v625_v4 = vpop.eup %624  ;;  %448 = vst [vmem:[#allocation10] sm:$0xff] %v446_v3 }
 0x2d7   :  { %v445_v5 = vmul.f32 %v625_v4, %v621_v63 }
 0x2d9   :  { %v447_v6 = vsel %vm437_vm2, %v625_v4, %v445_v5 }
 0x2da   :  { %449 = vst [vmem:[#allocation10 + $0x8] sm:$0xff] %v447_v6 }
 0x2db   :  { %717 = shalt.err (!%p714_p10)
}
 0x2dc   :  { %461 = dma.vmem_to_hbm [thread:$0]  %s456_s6, 256, %s861_s7, [#allocation4], %s738_s11, %s738_s11, %s739_s12  }
 0x2dd   :  { %732 = dma.done.wait [#allocation4], 256  }
 0x2de   :  { %733 = vsyncadd [#allocation4], 4294967040 }
 0x2df   :  { %465 = vsyncpa [#allocation3], 1 }
 0x2e0   :  { %466 = vsyncpa [#allocation6], 1 }
 0x2e1   :  { %467 = vsyncpa [#allocation9], 1 }
 0x2e2   :  { %468 = vsyncpa [#allocation4], 1 }

// kernel: tpu_custom_call.1
= control target key start
LH: loop header
LB: loop body
LE: loop exit
PB: predicated region body
PF: predicated region fallthrough
CT: control target
= control target key end

     0   :  { %12 = vsyncpa [#allocation3], 0  ;;  %s854_s0 = inlined_call_operand.hbm [shape: f32[16,128], index: 0, kind: input, shape index: {}]   ;;  %s855_s1 = inlined_call_operand.hbm [shape: bf16[128,128], index: 1, kind: input, shape index: {}]   ;;  %s856_s2 = inlined_call_operand.vmem [shape: f32[1,128], index: 2, kind: input, shape index: {}]   ;;  %s857_s3 = inlined_call_operand.hbm [shape: bf16[128,128], index: 3, kind: input, shape index: {}]   ;;  %s858_s4 = inlined_call_operand.vmem [shape: f32[1,128], index: 4, kind: input, shape index: {}]   ;;  %s859_s5 = inlined_call_operand.hbm [shape: bf16[128,128], index: 5, kind: input, shape index: {}]   ;;  %s860_s6 = inlined_call_operand.vmem [shape: f32[1,128], index: 6, kind: input, shape index: {}]   ;;  %s861_s7 = inlined_call_operand.hbm [shape: f32[16,128], index: 7, kind: output, shape index: {}]  }
   0x1   :  { %13 = vsyncpa [#allocation6], 0 }
   0x2   :  { %14 = vsyncpa [#allocation9], 0 }
   0x3   :  { %15 = vsyncpa [#allocation4], 0  ;;  %s734_s24 = smov [#allocation5]  }
   0x4   :  { %s33_s25 = sshll.u32 %s734_s24, 4  ;;  %s34_s25 = int_to_ptr.vmem [resolvable:$true] %s33_s25 }
   0x5   :  { %s634_s26 = scalar_lea.vmem %s34_s25, 1024  ;;  %p639_p1 = scmp.lt.s32.totalorder %s34_s25, %s34_s25 }
   0x6   :  { %p635_p0 = scmp.ne.s32.totalorder %s34_s25, %s634_s26  ;;  %p640_p2 = scmp.lt.s32.totalorder %s634_s26, %s634_s26 }
   0x8   :  { %p641_p3 = por %p640_p2, %p639_p1 }
   0xa   :  { %p642_p4 = pnand %p641_p3, %p635_p0 }
   0xc   :  { %645 = shalt.err (!%p642_p4)
}
   0xd   :  { %s735_s27 = smov 64   ;;  %s736_s28 = smov 4  }
   0xe   :  { %39 = dma.hbm_to_vmem [thread:$0]  %s855_s1, 1024, %s34_s25, [#allocation6], %s735_s27, %s735_s27, %s736_s28  }
   0xf   :  { %s737_s8 = smov [#allocation2]  }
  0x10   :  { %s21_s9 = sshll.u32 %s737_s8, 4  ;;  %s22_s9 = int_to_ptr.vmem [resolvable:$true] %s21_s9 }
  0x11   :  { %s654_s10 = scalar_lea.vmem %s22_s9, 256  ;;  %p659_p6 = scmp.lt.s32.totalorder %s22_s9, %s22_s9 }
  0x12   :  { %p655_p5 = scmp.ne.s32.totalorder %s22_s9, %s654_s10  ;;  %p660_p7 = scmp.lt.s32.totalorder %s654_s10, %s654_s10 }
  0x14   :  { %p661_p8 = por %p660_p7, %p659_p6 }
  0x16   :  { %p662_p9 = pnand %p661_p8, %p655_p5 }
  0x18   :  { %665 = shalt.err (!%p662_p9)
}
  0x19   :  { %s738_s11 = smov 128   ;;  %s739_s12 = smov 8  }
  0x1a   :  { %27 = dma.hbm_to_vmem [thread:$0]  %s854_s0, 256, %s22_s9, [#allocation3], %s738_s11, %s738_s11, %s739_s12  }
  0x1b   :  { %s740_s1 = smov [#allocation7]   ;;  %s741_s16 = smov [#allocation8]  }
  0x1c   :  { %s47_s15 = sshll.u32 %s740_s1, 4  ;;  %s61_s17 = sshll.u32 %s741_s16, 4  ;;  %s48_s15 = int_to_ptr.vmem [resolvable:$true] %s47_s15  ;;  %s62_s17 = int_to_ptr.vmem [resolvable:$true] %s61_s17 }
  0x1d   :  { %s674_s18 = scalar_lea.vmem %s48_s15, 1024  ;;  %p679_p11 = scmp.lt.s32.totalorder %s48_s15, %s48_s15 }
  0x1e   :  { %p675_p10 = scmp.ne.s32.totalorder %s48_s15, %s674_s18  ;;  %p680_p12 = scmp.lt.s32.totalorder %s674_s18, %s674_s18 }
  0x20   :  { %p681_p13 = por %p680_p12, %p679_p11 }
  0x22   :  { %p682_p0 = pnand %p681_p13, %p675_p10 }
  0x24   :  { %685 = shalt.err (!%p682_p0)
}
  0x25   :  { %53 = dma.hbm_to_vmem [thread:$0]  %s857_s3, 1024, %s48_s15, [#allocation6], %s735_s27, %s735_s27, %s736_s28  }
  0x26   :  { %s694_s0 = scalar_lea.vmem %s62_s17, 1024  ;;  %p699_p2 = scmp.lt.s32.totalorder %s62_s17, %s62_s17 }
  0x27   :  { %p695_p1 = scmp.ne.s32.totalorder %s62_s17, %s694_s0  ;;  %p700_p3 = scmp.lt.s32.totalorder %s694_s0, %s694_s0 }
  0x29   :  { %p701_p4 = por %p700_p3, %p699_p2 }
  0x2b   :  { %p702_p5 = pnand %p701_p4, %p695_p1 }
  0x2d   :  { %705 = shalt.err (!%p702_p5)
}
  0x2e   :  { %67 = dma.hbm_to_vmem [thread:$0]  %s859_s5, 1024, %s62_s17, [#allocation9], %s735_s27, %s735_s27, %s736_s28  }
  0x2f   :  { %726 = dma.done.wait [#allocation3], 256  }
  0x30   :  { %727 = vsyncadd [#allocation3], 4294967040 }
  0x31   :  { %728 = dma.done.wait [#allocation6], 2048  }
  0x32   :  { %729 = vsyncadd [#allocation6], 4294965248 }
  0x33   :  { %730 = dma.done.wait [#allocation9], 1024  }
  0x34   :  { %731 = vsyncadd [#allocation9], 4294966272  ;;  %v742_v0 = vmov 0.0   ;;  %vm743_vm0 = vmmov 0   ;;  %v594_v1 = vld [vmem:[#allocation5 + $0x38] sm:$0xff]   ;;  %v595_v2 = vld [vmem:[#allocation5 + $0x30] sm:$0xff]  }
  0x35   :  { %523 = vmatprep.subr.bf16.mxu0 %v742_v0  ;;  %539 = vmatprep.mubr.msk.bf16.mxu0 %vm743_vm0, %v742_v0  ;;  %v596_v3 = vld [vmem:[#allocation5 + $0x28] sm:$0xff]   ;;  %v602_v4 = vld [vmem:[#allocation7 + $0x38] sm:$0xff]   ;;  %v597_v5 = vld [vmem:[#allocation5 + $0x20] sm:$0xff]  }
  0x36   :  { %543 = vmatprep.subr.bf16.mxu1 %v742_v0  ;;  %559 = vmatprep.mubr.msk.bf16.mxu1 %vm743_vm0, %v742_v0  ;;  %v603_v6 = vld [vmem:[#allocation7 + $0x30] sm:$0xff]   ;;  %v598_v7 = vld [vmem:[#allocation5 + $0x18] sm:$0xff]   ;;  %v604_v8 = vld [vmem:[#allocation7 + $0x28] sm:$0xff]  }
  0x37   :  { %524 = vmatpush3.bf16.msra.mxu0 %v594_v1  ;;  %544 = vmatpush3.bf16.msra.mxu1 %v602_v4  ;;  %v599_v9 = vld [vmem:[#allocation5 + $0x10] sm:$0xff]   ;;  %v605_v10 = vld [vmem:[#allocation7 + $0x20] sm:$0xff]   ;;  %v600_v11 = vld [vmem:[#allocation5 + $0x8] sm:$0xff]  }
  0x38   :  { %525 = vmatprep.subr.bf16.mxu0 %v742_v0  ;;  %545 = vmatprep.subr.bf16.mxu1 %v742_v0  ;;  %v606_v12 = vld [vmem:[#allocation7 + $0x18] sm:$0xff]   ;;  %v601_v13 = vld [vmem:[#allocation5] sm:$0xff]   ;;  %v83_v14 = vld [vmem:[#allocation2] sm:$0xff] }
  0x39   :  { %v84_v15 = vld [vmem:[#allocation2 + $0x8] sm:$0xff]  ;;  %v607_v17 = vld [vmem:[#allocation7 + $0x10] sm:$0xff]   ;;  %v608_v18 = vld [vmem:[#allocation7 + $0x8] sm:$0xff]  }
  0x3a   :  { %v102_v16 = vpack.c.bf16 %v84_v15, %v83_v14  ;;  %v609_v19 = vld [vmem:[#allocation7] sm:$0xff]   ;;  %v610_v20 = vld [vmem:[#allocation8 + $0x38] sm:$0xff]   ;;  %v611_v21 = vld [vmem:[#allocation8 + $0x30] sm:$0xff]  }
  0x3b   :  { %526 = vmatpush3.bf16.msra.mxu0 %v595_v2  ;;  %546 = vmatpush3.bf16.msra.mxu1 %v603_v6  ;;  %v612_v22 = vld [vmem:[#allocation8 + $0x28] sm:$0xff]   ;;  %v613_v23 = vld [vmem:[#allocation8 + $0x20] sm:$0xff]   ;;  %v614_v24 = vld [vmem:[#allocation8 + $0x18] sm:$0xff]  }
  0x3c   :  { %527 = vmatprep.subr.bf16.mxu0 %v742_v0  ;;  %547 = vmatprep.subr.bf16.mxu1 %v742_v0  ;;  %v469_v25 = vld [vmem:[%s856_s2] ss:$0 sm:$0xff]  ;;  %v616_v36 = vld [vmem:[#allocation8 + $0x8] sm:$0xff]   ;;  %v617_v37 = vld [vmem:[#allocation8] sm:$0xff]  }
  0x3d   :  { %v615_v35 = vld [vmem:[#allocation8 + $0x10] sm:$0xff]  }
  0x3e   :  { %v478_v38 = vld [vmem:[%s858_s4] ss:$0 sm:$0xff]  ;;  %s744_s4 = smov [#allocation10]  }
  0x3f   :  { %528 = vmatpush3.bf16.msra.mxu0 %v596_v3  ;;  %548 = vmatpush3.bf16.msra.mxu1 %v604_v8  ;;  %v487_v48 = vld [vmem:[%s860_s6] ss:$0 sm:$0xff]  ;;  %s455_s6 = sshll.u32 %s744_s4, 4  ;;  %s456_s6 = int_to_ptr.vmem [resolvable:$true] %s455_s6 }
  0x40   :  { %529 = vmatprep.subr.bf16.mxu0 %v742_v0  ;;  %549 = vmatprep.subr.bf16.mxu1 %v742_v0  ;;  %s706_s26 = scalar_lea.vmem %s456_s6, 256  ;;  %p711_p7 = scmp.lt.s32.totalorder %s456_s6, %s456_s6 }
  0x41   :  { %p707_p6 = scmp.ne.s32.totalorder %s456_s6, %s706_s26  ;;  %p712_p8 = scmp.lt.s32.totalorder %s706_s26, %s706_s26 }
  0x43   :  { %530 = vmatpush3.bf16.msra.mxu0 %v597_v5  ;;  %550 = vmatpush3.bf16.msra.mxu1 %v605_v10  ;;  %p713_p9 = por %p712_p8, %p711_p7 }
  0x44   :  { %531 = vmatprep.subr.bf16.mxu0 %v742_v0  ;;  %551 = vmatprep.subr.bf16.mxu1 %v742_v0 }
  0x45   :  { %p714_p10 = pnand %p713_p9, %p707_p6 }
  0x47   :  { %532 = vmatpush3.bf16.msra.mxu0 %v598_v7  ;;  %552 = vmatpush3.bf16.msra.mxu1 %v606_v12 }
  0x48   :  { %533 = vmatprep.subr.bf16.mxu0 %v742_v0  ;;  %553 = vmatprep.subr.bf16.mxu1 %v742_v0 }
  0x4b   :  { %534 = vmatpush3.bf16.msra.mxu0 %v599_v9  ;;  %554 = vmatpush3.bf16.msra.mxu1 %v607_v17 }
  0x4c   :  { %535 = vmatprep.subr.bf16.mxu0 %v742_v0  ;;  %555 = vmatprep.subr.bf16.mxu1 %v742_v0 }
  0x4f   :  { %536 = vmatpush3.bf16.msra.mxu0 %v600_v11  ;;  %556 = vmatpush3.bf16.msra.mxu1 %v608_v18 }
  0x50   :  { %537 = vmatprep.subr.bf16.mxu0 %v742_v0  ;;  %557 = vmatprep.subr.bf16.mxu1 %v742_v0 }
  0x53   :  { %538 = vmatpush3.bf16.msra.mxu0 %v601_v13  ;;  %558 = vmatpush3.bf16.msra.mxu1 %v609_v19 }
  0x54   :  { %563 = vmatprep.subr.bf16.mxu0 %v742_v0 }
  0x56   :  { %540 = vmatmul.mubr.bf16.vlgmr.msra.gmra.mxu0 %v102_v16 }
  0x57   :  { %579 = vmatprep.mubr.msk.bf16.mxu0 %vm743_vm0, %v742_v0  ;;  %564 = vmatpush3.bf16.msra.mxu0 %v610_v20 }
  0x58   :  { %565 = vmatprep.subr.bf16.mxu0 %v742_v0 }
  0x5b   :  { %566 = vmatpush3.bf16.msra.mxu0 %v611_v21 }
  0x5c   :  { %567 = vmatprep.subr.bf16.mxu0 %v742_v0 }
  0x5f   :  { %568 = vmatpush3.bf16.msra.mxu0 %v612_v22 }
  0x60   :  { %569 = vmatprep.subr.bf16.mxu0 %v742_v0 }
  0x63   :  { %570 = vmatpush3.bf16.msra.mxu0 %v613_v23 }
  0x64   :  { %571 = vmatprep.subr.bf16.mxu0 %v742_v0 }
  0x67   :  { %572 = vmatpush3.bf16.msra.mxu0 %v614_v24 }
  0x68   :  { %573 = vmatprep.subr.bf16.mxu0 %v742_v0 }
  0x6b   :  { %574 = vmatpush3.bf16.msra.mxu0 %v615_v35 }
  0x6c   :  { %575 = vmatprep.subr.bf16.mxu0 %v742_v0 }
  0x6f   :  { %576 = vmatpush3.bf16.msra.mxu0 %v616_v36 }
  0x70   :  { %577 = vmatprep.subr.bf16.mxu0 %v742_v0 }
  0x73   :  { %578 = vmatpush3.bf16.msra.mxu0 %v617_v37 }
 0x116   :  { %v191_v26 = vpop.f32.mrf.mxu0 }
 0x117   :  { %v192_v28 = vadd.f32 %v469_v25, %v191_v26 }
 0x118   :  { %v541_v27 = vpop.f32.mrf.mxu0 }
 0x119   :  { %v198_v32 = vmax.f32 %v192_v28, 0.0 }
 0x11a   :  { %v194_v29 = vpop.f32.mrf.mxu0 }
 0x11b   :  { %v195_v30 = vadd.f32 %v469_v25, %v194_v29 }
 0x11c   :  { %v542_v31 = vpop.f32.mrf.mxu0 }
 0x11d   :  { %v199_v33 = vmax.f32 %v195_v30, 0.0 }
 0x11f   :  { %v217_v34 = vpack.c.bf16 %v199_v33, %v198_v32 }
 0x121   :  { %560 = vmatmul.mubr.bf16.vlgmr.msra.gmra.mxu1 %v217_v34 }
 0x1e1   :  { %v306_v39 = vpop.f32.mrf.mxu1 }
 0x1e2   :  { %v307_v41 = vadd.f32 %v478_v38, %v306_v39 }
 0x1e3   :  { %v561_v40 = vpop.f32.mrf.mxu1 }
 0x1e4   :  { %v313_v45 = vmax.f32 %v307_v41, 0.0 }
 0x1e5   :  { %v309_v42 = vpop.f32.mrf.mxu1 }
 0x1e6   :  { %v310_v43 = vadd.f32 %v478_v38, %v309_v42 }
 0x1e7   :  { %v562_v44 = vpop.f32.mrf.mxu1 }
 0x1e8   :  { %v314_v46 = vmax.f32 %v310_v43, 0.0 }
 0x1ea   :  { %v332_v47 = vpack.c.bf16 %v314_v46, %v313_v45 }
 0x1ec   :  { %580 = vmatmul.mubr.bf16.vlgmr.msra.gmra.mxu0 %v332_v47 }
 0x2ac   :  { %v421_v49 = vpop.f32.mrf.mxu0 }
 0x2ad   :  { %v422_v50 = vadd.f32 %v487_v48, %v421_v49 }
 0x2ae   :  { %v581_v51 = vpop.f32.mrf.mxu0 }
 0x2af   :  { %v428_v52 = vand.u32 2147483647, %v422_v50  ;;  %vm436_vm1 = vcmp.ge.f32.partialorder %v422_v50, 0.0 }
 0x2b0   :  { %v424_v53 = vpop.f32.mrf.mxu0 }
 0x2b1   :  { %v430_v54 = vsub.f32 0.0, %v428_v52  ;;  %v425_v55 = vadd.f32 %v487_v48, %v424_v53 }
 0x2b2   :  { %v582_v56 = vpop.f32.mrf.mxu0 }
 0x2b3   :  { %v432_v57 = vmul.f32 1.442695, %v430_v54  ;;  %v429_v58 = vand.u32 2147483647, %v425_v55  ;;  %vm437_vm2 = vcmp.ge.f32.partialorder %v425_v55, 0.0 }
 0x2b5   :  { %618 = vpow2.f32 %v432_v57  ;;  %v431_v59 = vsub.f32 0.0, %v429_v58 }
 0x2b7   :  { %v434_v60 = vmul.f32 1.442695, %v431_v59 }
 0x2b9   :  { %620 = vpow2.f32 %v434_v60 }
 0x2c2   :  { %v619_v61 = vpop.eup %618 }
 0x2c3   :  { %v438_v62 = vadd.f32 1.0, %v619_v61 }
 0x2c5   :  { %622 = vrcp.f32 %v438_v62 }
 0x2c6   :  { %v621_v63 = vpop.eup %620 }
 0x2c7   :  { %v439_v0 = vadd.f32 1.0, %v621_v63 }
 0x2c9   :  { %624 = vrcp.f32 %v439_v0 }
 0x2d2   :  { %v623_v1 = vpop.eup %622 }
 0x2d3   :  { %v444_v2 = vmul.f32 %v623_v1, %v619_v61 }
 0x2d5   :  { %v446_v3 = vsel %vm436_vm1, %v623_v1, %v444_v2 }
 0x2d6   :  { %v625_v4 = vpop.eup %624  ;;  %448 = vst [vmem:[#allocation10] sm:$0xff] %v446_v3 }
 0x2d7   :  { %v445_v5 = vmul.f32 %v625_v4, %v621_v63 }
 0x2d9   :  { %v447_v6 = vsel %vm437_vm2, %v625_v4, %v445_v5 }
 0x2da   :  { %449 = vst [vmem:[#allocation10 + $0x8] sm:$0xff] %v447_v6 }
 0x2db   :  { %717 = shalt.err (!%p714_p10)
}
 0x2dc   :  { %461 = dma.vmem_to_hbm [thread:$0]  %s456_s6, 256, %s861_s7, [#allocation4], %s738_s11, %s738_s11, %s739_s12  }
 0x2dd   :  { %732 = dma.done.wait [#allocation4], 256  }
 0x2de   :  { %733 = vsyncadd [#allocation4], 4294967040 }
 0x2df   :  { %465 = vsyncpa [#allocation3], 1 }
 0x2e0   :  { %466 = vsyncpa [#allocation6], 1 }
 0x2e1   :  { %467 = vsyncpa [#allocation9], 1 }
 0x2e2   :  { %468 = vsyncpa [#allocation4], 1 }

</bundles_post_ra>
